<compile_context>
chip_gen: v5e
topology: v5e:2x2
jax: 0.10.0
libtpu: 0.0.40
codegen_flags: <defaults>
</compile_context>

<pallas_src>
import jax
import jax.numpy as jnp
from jax.experimental import pallas as pl
from jax.experimental.pallas import tpu as pltpu


def _round_up(x, m):
    return (x + m - 1) // m * m


def _orinin_kernel(feats_ref, rays_ref, w1_ref, b1_ref, w2_ref, b2_ref, out_ref):
    f = feats_ref[...].astype(jnp.float32)      # (TM, H)
    r = rays_ref[...].astype(jnp.float32)       # (TM, Ds+Dm)

    # Fused MLP: [rd||ro] @ blockdiag(w1s, w1m) -> ReLU -> @ blockdiag(w2s, w2m)
    # produces [svar || mean] in one pair of MXU dots.
    h = jnp.dot(r, w1_ref[...], preferred_element_type=jnp.float32) + b1_ref[...]
    h = jnp.maximum(h, 0.0)
    sm = jnp.dot(h, w2_ref[...], preferred_element_type=jnp.float32) + b2_ref[...]

    H = f.shape[-1]
    svar = sm[:, :H]
    mn = sm[:, H:]

    # Instance norm over last dim (torch.var default is unbiased: /(H-1)).
    f_mean = jnp.mean(f, axis=-1, keepdims=True)
    diff = f - f_mean
    f_var = jnp.sum(diff * diff, axis=-1, keepdims=True) * (1.0 / (H - 1)) + 1e-5
    inv_std = jax.lax.rsqrt(f_var)

    # TODO(synk): optional lane-dense repack of the H=32 axis to (M/4, 128)
    # (segmented in-lane reduction) was left out; stores run at 32/128 lanes.
    out_ref[...] = (diff * inv_std * svar + mn).astype(out_ref.dtype)


def _fuse_params(params):
    """Build block-diagonal fused weights once, outside the kernel."""
    w1s, b1s, w2s, b2s, w1m, b1m, w2m, b2m = params
    Ds, H = w1s.shape
    Dm = w1m.shape[0]
    W1 = jnp.zeros((Ds + Dm, 2 * H), jnp.float32)
    W1 = W1.at[:Ds, :H].set(w1s).at[Ds:, H:].set(w1m)
    b1 = jnp.concatenate([b1s, b1m], axis=-1)
    W2 = jnp.zeros((2 * H, 2 * H), jnp.float32)
    W2 = W2.at[:H, :H].set(w2s).at[H:, H:].set(w2m)
    b2 = jnp.concatenate([b2s, b2m], axis=-1)
    return W1, b1, W2, b2


def orinin_forward(feats, rays_d, rays_o, params, *, tile_m=8192):
    B, N, H = feats.shape
    Ds = rays_d.shape[-1]
    Dm = rays_o.shape[-1]
    M = B * N
    K = Ds + Dm

    W1, b1, W2, b2 = _fuse_params(params)

    f2 = feats.reshape(M, H)
    r2 = jnp.concatenate([rays_d.reshape(M, Ds), rays_o.reshape(M, Dm)], axis=-1)

    # Tile sizing: as many rows per grid step as requested (HBM-bound kernel),
    # sublane-aligned, spread evenly over the grid so the zero-padded tail
    # stays below one sublane group.
    sub = 16 if feats.dtype == jnp.bfloat16 else 8
    num_tiles = int(pl.cdiv(M, tile_m))
    tile_rows = _round_up(int(pl.cdiv(M, num_tiles)), sub)
    M_pad = num_tiles * tile_rows
    if M_pad != M:
        f2 = jnp.pad(f2, ((0, M_pad - M), (0, 0)))
        r2 = jnp.pad(r2, ((0, M_pad - M), (0, 0)))

    itemsize = jnp.dtype(feats.dtype).itemsize
    cost = pl.CostEstimate(
        flops=int(M_pad * (2 * K * 2 * H + 2 * (2 * H) * (2 * H) + 8 * H)),
        transcendentals=int(M_pad),
        bytes_accessed=int(M_pad * 2 * H * itemsize          # feats in + out
                           + M_pad * K * 4                   # rays
                           + 4 * (W1.size + b1.size + W2.size + b2.size)),
    )

    row_spec = lambda d: pl.BlockSpec((tile_rows, d), lambda i: (i, 0))
    full_spec = lambda s: pl.BlockSpec(s, lambda i: (0, 0))

    out = pl.pallas_call(
        _orinin_kernel,
        out_shape=jax.ShapeDtypeStruct((M_pad, H), feats.dtype),
        grid_spec=pltpu.PrefetchScalarGridSpec(
            num_scalar_prefetch=0,
            grid=(num_tiles,),
            in_specs=[
                row_spec(H),                 # feats rows
                row_spec(K),                 # [rays_d || rays_o] rows
                full_spec((K, 2 * H)),       # W1 (block diagonal)
                full_spec((1, 2 * H)),       # b1
                full_spec((2 * H, 2 * H)),   # W2 (block diagonal)
                full_spec((1, 2 * H)),       # b2
            ],
            out_specs=pl.BlockSpec((tile_rows, H), lambda i: (i, 0)),
        ),
        compiler_params=pltpu.CompilerParams(
            dimension_semantics=("parallel",),      # megacore sharding on v7x
            vmem_limit_bytes=32 * 1024 * 1024,      # safe on v5e/v6e/v7x
        ),
        cost_estimate=cost,
    )(f2, r2, W1, b1, W2, b2)

    if M_pad != M:
        out = out[:M]
    return out.reshape(B, N, H)


def init_params(key, mean_dim, svar_dim, hidden_dim, random_outer=False):
    """Init mirroring ORININ.__init__: inner MLP layers get (deterministic)
    random init.  With random_outer=False the outer `svar`/`mean` linears are
    reset_parameters()'ed (weight 0, bias 1 / weight 0, bias 0); with
    random_outer=True they get random values (to fully exercise the fused MLP
    in tests)."""
    k1, k2, k3, k4, k5, k6, k7, k8 = jax.random.split(key, 8)
    w1s = jax.random.normal(k1, (svar_dim, hidden_dim), jnp.float32) * 0.1
    b1s = jax.random.normal(k2, (1, hidden_dim), jnp.float32) * 0.1
    w1m = jax.random.normal(k3, (mean_dim, hidden_dim), jnp.float32) * 0.1
    b1m = jax.random.normal(k4, (1, hidden_dim), jnp.float32) * 0.1
    if random_outer:
        w2s = jax.random.normal(k5, (hidden_dim, hidden_dim), jnp.float32) * 0.1
        b2s = jax.random.normal(k6, (1, hidden_dim), jnp.float32) * 0.1
        w2m = jax.random.normal(k7, (hidden_dim, hidden_dim), jnp.float32) * 0.1
        b2m = jax.random.normal(k8, (1, hidden_dim), jnp.float32) * 0.1
    else:
        # reset_parameters(): svar.weight=0, svar.bias=1, mean.weight=0, mean.bias=0
        w2s = jnp.zeros((hidden_dim, hidden_dim), jnp.float32)
        b2s = jnp.ones((1, hidden_dim), jnp.float32)
        w2m = jnp.zeros((hidden_dim, hidden_dim), jnp.float32)
        b2m = jnp.zeros((1, hidden_dim), jnp.float32)
    return (w1s, b1s, w2s, b2s, w1m, b1m, w2m, b2m)


def orinin_reference(feats, rays_d, rays_o, params):
    w1s, b1s, w2s, b2s, w1m, b1m, w2m, b2m = params
    svar = jnp.maximum(rays_d @ w1s + b1s, 0.0) @ w2s + b2s
    mn = jnp.maximum(rays_o @ w1m + b1m, 0.0) @ w2m + b2m
    H = feats.shape[-1]
    f_mean = feats.mean(-1, keepdims=True)
    f_var = ((feats - f_mean) ** 2).sum(-1, keepdims=True) / (H - 1) + 1e-5
    return (feats - f_mean) / jnp.sqrt(f_var) * svar + mn


if __name__ == "__main__":
    mean_dim = svar_dim = 3   # ray origin / direction are 3-vectors
    hidden_dim = 32           # feats channel dim == hidden_dim

    key = jax.random.PRNGKey(0)
    kf, kd, ko, kp = jax.random.split(key, 4)

    # Case 1: default (reset_parameters) init, M divisible by the sublane count.
    B, N = 2, 8
    feats = jax.random.normal(kf, (B, N, hidden_dim), jnp.float32)
    rays_d = jax.random.normal(kd, (B, N, svar_dim), jnp.float32)
    rays_o = jax.random.normal(ko, (B, N, mean_dim), jnp.float32)
    params = init_params(kp, mean_dim, svar_dim, hidden_dim, random_outer=False)

    out = jax.block_until_ready(orinin_forward(feats, rays_d, rays_o, params))
    ref = orinin_reference(feats, rays_d, rays_o, params)
    assert out.shape == (B, N, hidden_dim)
    assert jnp.allclose(out, ref, atol=1e-4, rtol=1e-4), "mismatch vs reference (case 1)"

    # Case 2: random outer weights (exercises fused block-diagonal MLP) and a
    # ragged row count (exercises the zero-padded tail path).
    B2, N2 = 2, 13
    k2 = jax.random.PRNGKey(1)
    kf2, kd2, ko2, kp2 = jax.random.split(k2, 4)
    feats2 = jax.random.normal(kf2, (B2, N2, hidden_dim), jnp.float32)
    rays_d2 = jax.random.normal(kd2, (B2, N2, svar_dim), jnp.float32)
    rays_o2 = jax.random.normal(ko2, (B2, N2, mean_dim), jnp.float32)
    params2 = init_params(kp2, mean_dim, svar_dim, hidden_dim, random_outer=True)

    out2 = jax.block_until_ready(orinin_forward(feats2, rays_d2, rays_o2, params2))
    ref2 = orinin_reference(feats2, rays_d2, rays_o2, params2)
    assert out2.shape == (B2, N2, hidden_dim)
    assert jnp.allclose(out2, ref2, atol=1e-4, rtol=1e-4), "mismatch vs reference (case 2)"

    print("KERNEL_OK")
</pallas_src>

<mosaic_0001>
module attributes {stable_mosaic.version = 11 : i64} {
  func.func @_orinin_kernel(%arg0: i32, %arg1: memref<16x32xf32, #tpu.memory_space<vmem>>, %arg2: memref<16x6xf32, #tpu.memory_space<vmem>>, %arg3: memref<6x64xf32, #tpu.memory_space<vmem>>, %arg4: memref<1x64xf32, #tpu.memory_space<vmem>>, %arg5: memref<64x64xf32, #tpu.memory_space<vmem>>, %arg6: memref<1x64xf32, #tpu.memory_space<vmem>>, %arg7: memref<16x32xf32, #tpu.memory_space<vmem>>) attributes {dimension_semantics = [#tpu.dimension_semantics<parallel>], iteration_bounds = array<i64: 1>, scalar_prefetch = 0 : i64, scratch_operands = 0 : i64, tpu.core_type = #tpu.core_type<tc>, window_params = [{transform_indices = @transform_0, window_bounds = array<i64: 16, 32>}, {transform_indices = @transform_1, window_bounds = array<i64: 16, 6>}, {pipeline_mode = #tpu.pipeline_mode<synchronous>, transform_indices = @transform_2, window_bounds = array<i64: 6, 64>}, {pipeline_mode = #tpu.pipeline_mode<synchronous>, transform_indices = @transform_3, window_bounds = array<i64: 1, 64>}, {pipeline_mode = #tpu.pipeline_mode<synchronous>, transform_indices = @transform_4, window_bounds = array<i64: 64, 64>}, {pipeline_mode = #tpu.pipeline_mode<synchronous>, transform_indices = @transform_5, window_bounds = array<i64: 1, 64>}, {transform_indices = @transform_6, window_bounds = array<i64: 16, 32>}]} {
    %c0 = arith.constant 0 : index
    %c0_0 = arith.constant 0 : index
    %0 = vector.load %arg1[%c0, %c0_0] : memref<16x32xf32, #tpu.memory_space<vmem>>, vector<16x32xf32>
    %c0_1 = arith.constant 0 : index
    %c0_2 = arith.constant 0 : index
    %1 = vector.load %arg2[%c0_1, %c0_2] : memref<16x6xf32, #tpu.memory_space<vmem>>, vector<16x6xf32>
    %c0_3 = arith.constant 0 : index
    %c0_4 = arith.constant 0 : index
    %2 = vector.load %arg3[%c0_3, %c0_4] : memref<6x64xf32, #tpu.memory_space<vmem>>, vector<6x64xf32>
    %cst = arith.constant dense<0.000000e+00> : vector<16x64xf32>
    %3 = tpu.matmul %1, %2, %cst {dimension_numbers = #tpu.dot_dimension_numbers<[1], [0], [0], [1], [0, 0, 1, 1], [], []>} : vector<16x6xf32>, vector<6x64xf32>, vector<16x64xf32> -> vector<16x64xf32>
    %c0_5 = arith.constant 0 : index
    %c0_6 = arith.constant 0 : index
    %4 = vector.load %arg4[%c0_5, %c0_6] : memref<1x64xf32, #tpu.memory_space<vmem>>, vector<1x64xf32>
    %5 = vector.broadcast %4 : vector<1x64xf32> to vector<16x64xf32>
    %6 = arith.addf %3, %5 : vector<16x64xf32>
    %cst_7 = arith.constant 0.000000e+00 : f32
    %7 = vector.broadcast %cst_7 : f32 to vector<16x64xf32>
    %8 = arith.maximumf %6, %7 : vector<16x64xf32>
    %c0_8 = arith.constant 0 : index
    %c0_9 = arith.constant 0 : index
    %9 = vector.load %arg5[%c0_8, %c0_9] : memref<64x64xf32, #tpu.memory_space<vmem>>, vector<64x64xf32>
    %cst_10 = arith.constant dense<0.000000e+00> : vector<16x64xf32>
    %10 = tpu.matmul %8, %9, %cst_10 {dimension_numbers = #tpu.dot_dimension_numbers<[1], [0], [0], [1], [0, 0, 1, 1], [], []>} : vector<16x64xf32>, vector<64x64xf32>, vector<16x64xf32> -> vector<16x64xf32>
    %c0_11 = arith.constant 0 : index
    %c0_12 = arith.constant 0 : index
    %11 = vector.load %arg6[%c0_11, %c0_12] : memref<1x64xf32, #tpu.memory_space<vmem>>, vector<1x64xf32>
    %12 = vector.broadcast %11 : vector<1x64xf32> to vector<16x64xf32>
    %13 = arith.addf %10, %12 : vector<16x64xf32>
    %14 = vector.extract_strided_slice %13 {offsets = [0, 0], sizes = [16, 32], strides = [1, 1]} : vector<16x64xf32> to vector<16x32xf32>
    %15 = vector.extract_strided_slice %13 {offsets = [0, 32], sizes = [16, 32], strides = [1, 1]} : vector<16x64xf32> to vector<16x32xf32>
    %cst_13 = arith.constant dense<0.000000e+00> : vector<16xf32>
    %16 = vector.multi_reduction <add>, %0, %cst_13 [1] : vector<16x32xf32> to vector<16xf32>
    %17 = vector.shape_cast %16 : vector<16xf32> to vector<16x1xf32>
    %cst_14 = arith.constant 3.200000e+01 : f32
    %18 = vector.broadcast %cst_14 : f32 to vector<16x1xf32>
    %19 = arith.divf %17, %18 : vector<16x1xf32>
    %20 = vector.broadcast %19 : vector<16x1xf32> to vector<16x32xf32>
    %21 = arith.subf %0, %20 : vector<16x32xf32>
    %22 = arith.mulf %21, %21 : vector<16x32xf32>
    %cst_15 = arith.constant dense<0.000000e+00> : vector<16xf32>
    %23 = vector.multi_reduction <add>, %22, %cst_15 [1] : vector<16x32xf32> to vector<16xf32>
    %24 = vector.shape_cast %23 : vector<16xf32> to vector<16x1xf32>
    %cst_16 = arith.constant 0.0322580636 : f32
    %25 = vector.broadcast %cst_16 : f32 to vector<16x1xf32>
    %26 = arith.mulf %24, %25 : vector<16x1xf32>
    %cst_17 = arith.constant 9.99999974E-6 : f32
    %27 = vector.broadcast %cst_17 : f32 to vector<16x1xf32>
    %28 = arith.addf %26, %27 : vector<16x1xf32>
    %29 = math.rsqrt %28 : vector<16x1xf32>
    %30 = vector.broadcast %29 : vector<16x1xf32> to vector<16x32xf32>
    %31 = arith.mulf %21, %30 : vector<16x32xf32>
    %32 = arith.mulf %31, %14 : vector<16x32xf32>
    %33 = arith.addf %32, %15 : vector<16x32xf32>
    %c0_18 = arith.constant 0 : index
    %c0_19 = arith.constant 0 : index
    %34 = vector.load %arg7[%c0_18, %c0_19] : memref<16x32xf32, #tpu.memory_space<vmem>>, vector<16x32xf32>
    tpu.vector_store %arg7[%c0_18, %c0_19], %33 {strides = array<i32>} : memref<16x32xf32, #tpu.memory_space<vmem>>, vector<16x32xf32>,
    return
  }
  func.func @transform_0(%arg0: i32) -> (i32, i32) {
    %c0_i32 = arith.constant 0 : i32
    %c0_i32_0 = arith.constant 0 : i32
    return %arg0, %c0_i32 : i32, i32
  }
  func.func @transform_1(%arg0: i32) -> (i32, i32) {
    %c0_i32 = arith.constant 0 : i32
    %c0_i32_0 = arith.constant 0 : i32
    return %arg0, %c0_i32 : i32, i32
  }
  func.func @transform_2(%arg0: i32) -> (i32, i32) {
    %c0_i32 = arith.constant 0 : i32
    %c0_i32_0 = arith.constant 0 : i32
    %c0_i32_1 = arith.constant 0 : i32
    return %c0_i32, %c0_i32_0 : i32, i32
  }
  func.func @transform_3(%arg0: i32) -> (i32, i32) {
    %c0_i32 = arith.constant 0 : i32
    %c0_i32_0 = arith.constant 0 : i32
    %c0_i32_1 = arith.constant 0 : i32
    return %c0_i32, %c0_i32_0 : i32, i32
  }
  func.func @transform_4(%arg0: i32) -> (i32, i32) {
    %c0_i32 = arith.constant 0 : i32
    %c0_i32_0 = arith.constant 0 : i32
    %c0_i32_1 = arith.constant 0 : i32
    return %c0_i32, %c0_i32_0 : i32, i32
  }
  func.func @transform_5(%arg0: i32) -> (i32, i32) {
    %c0_i32 = arith.constant 0 : i32
    %c0_i32_0 = arith.constant 0 : i32
    %c0_i32_1 = arith.constant 0 : i32
    return %c0_i32, %c0_i32_0 : i32, i32
  }
  func.func @transform_6(%arg0: i32) -> (i32, i32) {
    %c0_i32 = arith.constant 0 : i32
    %c0_i32_0 = arith.constant 0 : i32
    return %arg0, %c0_i32 : i32, i32
  }
}

</mosaic_0001>

<bundles_post_ra>
// kernel: tpu_custom_call.1
= control target key start
LH: loop header
LB: loop body
LE: loop exit
PB: predicated region body
PF: predicated region fallthrough
CT: control target
= control target key end

     0   :  { %11 = vsyncpa [#allocation3], 0  ;;  %s371_s0 = inlined_call_operand.vmem [shape: f32[16,32], index: 0, kind: input, shape index: {}]   ;;  %s372_s1 = inlined_call_operand.vmem [shape: f32[16,6], index: 1, kind: input, shape index: {}]   ;;  %s373_s2 = inlined_call_operand.vmem [shape: f32[6,64], index: 2, kind: input, shape index: {}]   ;;  %s374_s3 = inlined_call_operand.vmem [shape: f32[1,64], index: 3, kind: input, shape index: {}]   ;;  %s375_s4 = inlined_call_operand.hbm [shape: f32[64,64], index: 4, kind: input, shape index: {}]   ;;  %s376_s5 = inlined_call_operand.vmem [shape: f32[1,64], index: 5, kind: input, shape index: {}]   ;;  %s377_s6 = inlined_call_operand.hbm [shape: f32[16,32], index: 6, kind: output, shape index: {}]  }
   0x1   :  { %12 = vsyncpa [#allocation4], 0  ;;  %s25_s23 = sshll.u32 %s375_s4, 4  ;;  %s291_s24 = smov [#allocation2]   ;;  %s26_s23 = int_to_ptr.hbm [resolvable:$true] %s25_s23 }
   0x2   :  { %s27_s25 = sshll.u32 %s291_s24, 4  ;;  %s292_s26 = smov 128   ;;  %s28_s25 = int_to_ptr.vmem [resolvable:$true] %s27_s25 }
   0x3   :  { %s293_s27 = smov 8  }
   0x4   :  { %33 = dma.hbm_to_vmem [thread:$0]  %s26_s23, 1024, %s28_s25, [#allocation3], %s292_s26, %s292_s26, %s293_s27  }
   0x5   :  { %287 = dma.done.wait [#allocation3], 1024  }
   0x6   :  { %288 = vsyncadd [#allocation3], 4294966272  ;;  %vm56_vm0 = vcmask 1045504   ;;  %vm127_vm1 = vcmask 261120   ;;  %vm49_vm2 = vcmask 48128   ;;  %v42_v1 = vld [vmem:[%s372_s1] sm:$0xff] }
   0x7   :  { %v44_v0 = vld [vmem:[%s373_s2] sm:$0x3f]  ;;  %v92_v4 = vld [vmem:[#allocation2 + $0x38] sm:$0xff]  ;;  %v41_v5 = vld [vmem:[%s371_s0 + $0x8] sm:$0xff]  ;;  %v294_v11 = vmov 32.0   ;;  %vm97_vm4 = vcmask 523264  }
   0x8   :  { %v40_v2 = vld [vmem:[%s371_s0] sm:$0xff]  ;;  %212 = vmatpush.msk.msra.mxu0 %vm56_vm0, %v44_v0  ;;  %112 = vmatpush.msra.mxu1 %v92_v4  ;;  %v43_v6 = vld [vmem:[%s372_s1 + $0x8] sm:$0xff]  ;;  %v131_v7 = vsel %vm127_vm1, %v41_v5, 0.0  ;;  %v91_v8 = vld [vmem:[#allocation2 + $0x30] sm:$0xff]  ;;  %233 = vrcp.f32 %v294_v11  ;;  %s199_s17 = sshll.u32 %s377_s6, 4  ;;  %s200_s17 = int_to_ptr.hbm [resolvable:$true] %s199_s17 }
   0x9   :  { %v128_v3 = vsel %vm127_vm1, %v40_v2, 0.0  ;;  %213 = vmatmul.msk.f32.vlgmr.msra.gmra.mxu0 %vm49_vm2, %v42_v1  ;;  %217 = vmatpush.msra.mxu2 %v92_v4  ;;  %v90_v9 = vld [vmem:[#allocation2 + $0x28] sm:$0xff]  ;;  %v89_v10 = vld [vmem:[#allocation2 + $0x20] sm:$0xff]  ;;  %v88_v12 = vld [vmem:[#allocation2 + $0x18] sm:$0xff] }
   0xa   :  { %129 = vadd.xlane.f32.xlu0 %v128_v3  ;;  %113 = vmatpush.msra.mxu1 %v91_v8  ;;  %v87_v13 = vld [vmem:[#allocation2 + $0x10] sm:$0xff]  ;;  %v86_v15 = vld [vmem:[#allocation2 + $0x8] sm:$0xff]  ;;  %v85_v16 = vld [vmem:[#allocation2] sm:$0xff] }
   0xb   :  { %218 = vmatpush.msra.mxu2 %v91_v8  ;;  %v231_v27 = vld [vmem:[%s374_s3] ss:$0 sm:$0xff]  ;;  %s295_s3 = smov 96  }
   0xc   :  { %114 = vmatpush.msra.mxu1 %v90_v9  ;;  %v232_v39 = vld [vmem:[%s376_s5] ss:$0 sm:$0xff]  ;;  %s296_s5 = smov [#allocation5]  }
   0xd   :  { %219 = vmatpush.msra.mxu2 %v90_v9  ;;  %s197_s14 = sshll.u32 %s296_s5, 4  ;;  %s198_s14 = int_to_ptr.vmem [resolvable:$true] %s197_s14 }
   0xe   :  { %115 = vmatpush.msra.mxu1 %v89_v10  ;;  %v234_v14 = vpop.eup %233 }
   0xf   :  { %220 = vmatpush.msra.mxu2 %v89_v10  ;;  %v135_v17 = vmul.f32 32.0, %v234_v14  ;;  %vm139_vm3 = vweird.f32 %v234_v14 }
  0x10   :  { %116 = vmatpush.msra.mxu1 %v88_v12 }
  0x11   :  { %214 = vmatmul.msk.f32.gmra.mxu0 %vm49_vm2, %v43_v6  ;;  %221 = vmatpush.msra.mxu2 %v88_v12  ;;  %v136_v18 = vsub.f32 1.0, %v135_v17 }
  0x12   :  { %132 = vadd.xlane.f32.xlu0 %v131_v7  ;;  %117 = vmatpush.msra.mxu1 %v87_v13 }
  0x13   :  { %222 = vmatpush.msra.mxu2 %v87_v13  ;;  %v137_v19 = vmul.f32 %v234_v14, %v136_v18 }
  0x14   :  { %118 = vmatpush.msra.mxu1 %v86_v15 }
  0x15   :  { %223 = vmatpush.msra.mxu2 %v86_v15  ;;  %v138_v20 = vadd.f32 %v234_v14, %v137_v19 }
  0x16   :  { %119 = vmatpush.msra.mxu1 %v85_v16 }
  0x17   :  { %224 = vmatpush.msra.mxu2 %v85_v16  ;;  %v140_v21 = vsel %vm139_vm3, %v234_v14, %v138_v20 }
  0x7d   :  { %v130_v22 = vpop.xlane.xlu0 %129 }
  0x7e   :  { %v141_v23 = vmul.f32 %v140_v21, %v130_v22 }
  0x80   :  { %v143_v24 = vsub.f32 %v40_v2, %v141_v23 }
  0x82   :  { %v145_v25 = vmul.f32 %v143_v24, %v143_v24 }
  0x84   :  { %v147_v26 = vsel %vm127_vm1, %v145_v25, 0.0 }
  0x85   :  { %148 = vadd.xlane.f32.xlu1 %v147_v26  ;;  %v133_v28 = vpop.xlane.xlu0 %132 }
  0x86   :  { %v142_v29 = vmul.f32 %v140_v21, %v133_v28  ;;  %v77_v30 = vpop.f32.mrf.mxu0 }
  0x87   :  { %v78_v32 = vadd.f32 %v231_v27, %v77_v30 }
  0x88   :  { %v144_v31 = vsub.f32 %v41_v5, %v142_v29 }
  0x89   :  { %v83_v33 = vmax.f32 %v78_v32, 0.0 }
  0x8a   :  { %v146_v34 = vmul.f32 %v144_v31, %v144_v31 }
  0x8b   :  { %215 = vmatmul.msk.f32.vlgmr.msra.gmra.mxu1 %vm97_vm4, %v83_v33 }
  0x8c   :  { %v150_v35 = vsel %vm127_vm1, %v146_v34, 0.0 }
  0x8d   :  { %151 = vadd.xlane.f32.xlu1 %v150_v35 }
  0x8e   :  { %v80_v36 = vpop.f32.mrf.mxu0 }
  0x8f   :  { %v81_v37 = vadd.f32 %v231_v27, %v80_v36 }
  0x91   :  { %v84_v38 = vmax.f32 %v81_v37, 0.0 }
  0x93   :  { %216 = vmatmul.msk.f32.vlgmr.msra.gmra.mxu2 %vm97_vm4, %v84_v38 }
  0xf8   :  { %v149_v44 = vpop.xlane.xlu1 %148 }
  0xf9   :  { %v153_v45 = vmul.f32 0.032258064, %v149_v44 }
  0xfb   :  { %v155_v46 = vadd.f32 1e-05, %v153_v45 }
  0xfd   :  { %235 = vrsqrt.f32 %v155_v46  ;;  %vm163_vm5 = vweird.f32 %v155_v46 }
 0x100   :  { %v152_v47 = vpop.xlane.xlu1 %151 }
 0x101   :  { %v154_v49 = vmul.f32 0.032258064, %v152_v47 }
 0x103   :  { %v236_v48 = vpop.eup %235  ;;  %v156_v51 = vadd.f32 1e-05, %v154_v49 }
 0x104   :  { %v158_v50 = vmul.f32 %v236_v48, %v155_v46  ;;  %vm164_vm6 = vweird.f32 %v236_v48 }
 0x105   :  { %237 = vrsqrt.f32 %v156_v51  ;;  %vm165_vm7 = vmor %vm163_vm5, %vm164_vm6  ;;  %vm173_vm8 = vweird.f32 %v156_v51 }
 0x106   :  { %v159_v52 = vmul.f32 %v236_v48, %v158_v50 }
 0x108   :  { %v121_v40 = vpop.f32.mrf.mxu1  ;;  %v160_v53 = vmul.f32 0.5, %v159_v52 }
 0x109   :  { %v122_v41 = vadd.f32 %v232_v39, %v121_v40 }
 0x10a   :  { %v161_v55 = vsub.f32 1.5, %v160_v53 }
 0x10b   :  { %183 = vrot.lane.b32.xlu2 %v122_v41, %s295_s3  ;;  %v238_v54 = vpop.eup %237 }
 0x10c   :  { %v168_v56 = vmul.f32 %v238_v54, %v156_v51  ;;  %v162_v57 = vmul.f32 %v236_v48, %v161_v55  ;;  %vm174_vm9 = vweird.f32 %v238_v54 }
 0x10d   :  { %vm175_vm10 = vmor %vm173_vm8, %vm174_vm9 }
 0x10e   :  { %v169_v58 = vmul.f32 %v238_v54, %v168_v56  ;;  %v166_v59 = vsel %vm165_vm7, %v236_v48, %v162_v57 }
 0x10f   :  { %v177_v61 = vmul.f32 %v166_v59, %v143_v24 }
 0x110   :  { %v170_v60 = vmul.f32 0.5, %v169_v58 }
 0x111   :  { %v179_v63 = vmul.f32 %v177_v61, %v122_v41 }
 0x112   :  { %v171_v62 = vsub.f32 1.5, %v170_v60 }
 0x114   :  { %v172_v2 = vmul.f32 %v238_v54, %v171_v62 }
 0x116   :  { %v124_v42 = vpop.f32.mrf.mxu2  ;;  %v176_v3 = vsel %vm175_vm10, %v238_v54, %v172_v2 }
 0x117   :  { %v125_v43 = vadd.f32 %v232_v39, %v124_v42  ;;  %v178_v4 = vmul.f32 %v176_v3, %v144_v31 }
 0x119   :  { %185 = vrot.lane.b32.xlu2 %v125_v43, %s295_s3  ;;  %v180_v5 = vmul.f32 %v178_v4, %v125_v43 }
 0x165   :  { %v184_v0 = vpop.permute.xlu2 %183 }
 0x166   :  { %v189_v1 = vadd.f32 %v184_v0, %v179_v63 }
 0x168   :  { %191 = vst.msk [vmem:[#allocation5] sm:$0xff] %vm127_vm1, %v189_v1 }
 0x173   :  { %v186_v6 = vpop.permute.xlu2 %185 }
 0x174   :  { %v190_v7 = vadd.f32 %v186_v6, %v180_v5 }
 0x176   :  { %192 = vst.msk [vmem:[#allocation5 + $0x8] sm:$0xff] %vm127_vm1, %v190_v7 }
 0x177   :  { %205 = dma.vmem_to_hbm [thread:$0]  %s198_s14, 256, %s200_s17, [#allocation4], %s292_s26, %s292_s26, %s293_s27  }
 0x178   :  { %289 = dma.done.wait [#allocation4], 256  }
 0x179   :  { %290 = vsyncadd [#allocation4], 4294967040 }
 0x17a   :  { %210 = vsyncpa [#allocation3], 1 }
 0x17b   :  { %211 = vsyncpa [#allocation4], 1 }

</bundles_post_ra>
